<compile_context>
chip_gen: v7x
topology: tpu7x:2x2x1
jax: 0.10.0
libtpu: 0.0.40
codegen_flags: <defaults>
</compile_context>

<pallas_src>
import math
import functools
import numpy as np

import jax
import jax.numpy as jnp
from jax import lax
from jax.experimental import pallas as pl
from jax.experimental.pallas import tpu as pltpu

EPS = 1e-6


def _default_vmem_limit():
    """Generation-aware scoped-VMEM budget: ~3/4 of physical, capped at 96 MiB."""
    try:
        info = pltpu.get_tpu_info()
        cap = getattr(info, "vmem_capacity_bytes", None)
        if cap:
            return min((int(cap) * 3) // 4, 96 * 1024 * 1024)
    except Exception:
        pass
    return 48 * 1024 * 1024      # safe on v5e/v6e (128 MiB) and v7x (64 MiB)


VMEM_LIMIT = _default_vmem_limit()
TM_PREF = 512 if VMEM_LIMIT >= 64 * 1024 * 1024 else 256   # bigger row tiles on v5e/v6e


# ------------------------------ tiling helper ------------------------------

def _pick_tile(dim, preferred, align):
    """Largest tile <= preferred that is a multiple of `align` and divides `dim`;
    falls back to the full dim (block == full extent is always legal)."""
    # TODO(synk): for awkward dims, pad to a tile multiple instead of the full-dim
    # fallback to keep tiles in the 256-512 sweet spot on v7x's smaller VMEM.
    if dim <= preferred:
        return dim
    t = (preferred // align) * align
    while t >= align:
        if dim % t == 0:
            return t
        t -= align
    return dim


# ----------------------------- Pallas kernels ------------------------------

def _norm_kernel(x_ref, a_ref, b_ref, o_ref, *, eps):
    x = x_ref[...].astype(jnp.float32)                   # (tm, E)
    mean = jnp.mean(x, axis=-1, keepdims=True)
    c = x - mean
    var = jnp.sum(c * c, axis=-1, keepdims=True) / (x.shape[-1] - 1)   # unbiased
    o_ref[...] = (a_ref[...] * (c / (jnp.sqrt(var) + eps))
                  + b_ref[...]).astype(o_ref.dtype)


def pallas_norm(x2d, alpha, bias, eps=EPS, out_dtype=jnp.float32):
    """Row-tiled standalone Norm (used for the encoder's final norm)."""
    M, E = x2d.shape
    tm = _pick_tile(M, TM_PREF, 8)
    return pl.pallas_call(
        functools.partial(_norm_kernel, eps=eps),
        out_shape=jax.ShapeDtypeStruct((M, E), out_dtype),
        grid=(M // tm,),
        in_specs=[
            pl.BlockSpec((tm, E), lambda i: (i, 0)),
            pl.BlockSpec((1, E), lambda i: (0, 0)),
            pl.BlockSpec((1, E), lambda i: (0, 0)),
        ],
        out_specs=pl.BlockSpec((tm, E), lambda i: (i, 0)),
        compiler_params=pltpu.CompilerParams(
            dimension_semantics=("parallel",), vmem_limit_bytes=VMEM_LIMIT),
    )(x2d, alpha.reshape(1, E), bias.reshape(1, E))


# --- multi-output projection: y_i = (norm(x)|x) @ w_i + b_i, emitted bf16 -----

def _multi_proj_kernel(*refs, n_out, has_norm, eps):
    pos = 0
    x_ref = refs[pos]; pos += 1
    if has_norm:
        a_ref, c_ref = refs[pos], refs[pos + 1]; pos += 2
    w_refs = refs[pos:pos + n_out]; pos += n_out
    b_refs = refs[pos:pos + n_out]; pos += n_out
    o_refs = refs[pos:pos + n_out]

    x = x_ref[...]
    if has_norm:
        x = x.astype(jnp.float32)
        mean = jnp.mean(x, axis=-1, keepdims=True)
        cen = x - mean
        var = jnp.sum(cen * cen, axis=-1, keepdims=True) / (x.shape[-1] - 1)
        x = a_ref[...] * (cen / (jnp.sqrt(var) + eps)) + c_ref[...]
    xb = x.astype(jnp.bfloat16)
    for w_ref, b_ref, o_ref in zip(w_refs, b_refs, o_refs):
        y = jnp.dot(xb, w_ref[...].astype(jnp.bfloat16),
                    preferred_element_type=jnp.float32) + b_ref[...]
        o_ref[...] = y.astype(o_ref.dtype)


def pallas_multi_proj(x2d, weights, biases, norm=None, eps=EPS,
                      out_dtype=jnp.bfloat16, tm_pref=None):
    """Fused (optional pre-LN) + several Linear heads sharing the same input tile.
    Norm is computed exactly once per row tile; no XLA slicing of a fused output."""
    M, E = x2d.shape
    n_out = len(weights)
    tm = _pick_tile(M, tm_pref or TM_PREF, 8)

    in_specs = [pl.BlockSpec((tm, E), lambda i: (i, 0))]
    args = [x2d]
    if norm is not None:
        alpha, nbias = norm
        in_specs += [pl.BlockSpec((1, E), lambda i: (0, 0)),
                     pl.BlockSpec((1, E), lambda i: (0, 0))]
        args += [alpha.reshape(1, E), nbias.reshape(1, E)]
    for w in weights:
        N = w.shape[1]
        in_specs.append(pl.BlockSpec((E, N), lambda i: (0, 0)))
        args.append(w)
    for w, b in zip(weights, biases):
        N = w.shape[1]
        in_specs.append(pl.BlockSpec((1, N), lambda i: (0, 0)))
        args.append(b.reshape(1, N))

    out_shapes, out_specs = [], []
    for w in weights:
        N = w.shape[1]
        out_shapes.append(jax.ShapeDtypeStruct((M, N), out_dtype))
        out_specs.append(pl.BlockSpec((tm, N), lambda i: (i, 0)))

    outs = pl.pallas_call(
        functools.partial(_multi_proj_kernel, n_out=n_out,
                          has_norm=norm is not None, eps=eps),
        out_shape=tuple(out_shapes),
        grid=(M // tm,),
        in_specs=in_specs,
        out_specs=tuple(out_specs),
        compiler_params=pltpu.CompilerParams(
            dimension_semantics=("parallel",), vmem_limit_bytes=VMEM_LIMIT),
    )(*args)
    if not isinstance(outs, (tuple, list)):
        outs = (outs,)
    return tuple(outs)


# --- single-output tiled linear (M/N/K grid, f32 accumulator) -----------------

def _linear_kernel(x_ref, w_ref, b_ref, *rest, relu, has_residual):
    if has_residual:
        r_ref, o_ref, acc_ref = rest
    else:
        o_ref, acc_ref = rest
    k = pl.program_id(2)

    @pl.when(k == 0)
    def _():
        acc_ref[...] = jnp.zeros_like(acc_ref)

    acc_ref[...] += jnp.dot(x_ref[...].astype(jnp.bfloat16),
                            w_ref[...].astype(jnp.bfloat16),
                            preferred_element_type=jnp.float32)

    @pl.when(k == pl.num_programs(2) - 1)
    def _():
        y = acc_ref[...] + b_ref[...]
        if relu:
            y = jnp.maximum(y, 0.0)
        if has_residual:
            y = y + r_ref[...].astype(jnp.float32)
        o_ref[...] = y.astype(o_ref.dtype)


def pallas_linear(x2d, w, b, relu=False, residual=None, out_dtype=jnp.float32,
                  tm_pref=None, tn_pref=512, tk_pref=512):
    """y = x2d @ w + b (+ residual), tiled over M/N/K with f32 accumulation."""
    M, K = x2d.shape
    _, N = w.shape
    tm = _pick_tile(M, tm_pref or TM_PREF, 8)
    tn = _pick_tile(N, tn_pref, 128)
    tk = _pick_tile(K, tk_pref, 128)
    has_residual = residual is not None
    in_specs = [
        pl.BlockSpec((tm, tk), lambda i, j, k: (i, k)),
        pl.BlockSpec((tk, tn), lambda i, j, k: (k, j)),
        pl.BlockSpec((1, tn), lambda i, j, k: (0, j)),
    ]
    args = [x2d, w, b.reshape(1, N)]
    if has_residual:
        in_specs.append(pl.BlockSpec((tm, tn), lambda i, j, k: (i, j)))
        args.append(residual)
    return pl.pallas_call(
        functools.partial(_linear_kernel, relu=relu, has_residual=has_residual),
        out_shape=jax.ShapeDtypeStruct((M, N), out_dtype),
        grid=(M // tm, N // tn, K // tk),
        in_specs=in_specs,
        out_specs=pl.BlockSpec((tm, tn), lambda i, j, k: (i, j)),
        scratch_shapes=[pltpu.VMEM((tm, tn), jnp.float32)],
        compiler_params=pltpu.CompilerParams(
            dimension_semantics=("parallel", "parallel", "arbitrary"),
            vmem_limit_bytes=VMEM_LIMIT),
    )(*args)


# --- tiled norm+linear (vocab projection) with cached normalized tile ----------

def _norm_linear_kernel(x_ref, a_ref, c_ref, w_ref, b_ref, o_ref, xn_ref,
                        *, eps, relu):
    j = pl.program_id(1)

    @pl.when(j == 0)
    def _():
        x = x_ref[...].astype(jnp.float32)
        mean = jnp.mean(x, axis=-1, keepdims=True)
        cen = x - mean
        var = jnp.sum(cen * cen, axis=-1, keepdims=True) / (x.shape[-1] - 1)
        xn_ref[...] = (a_ref[...] * (cen / (jnp.sqrt(var) + eps))
                       + c_ref[...]).astype(jnp.bfloat16)

    y = jnp.dot(xn_ref[...], w_ref[...].astype(jnp.bfloat16),
                preferred_element_type=jnp.float32) + b_ref[...]
    if relu:
        y = jnp.maximum(y, 0.0)
    o_ref[...] = y.astype(o_ref.dtype)


def pallas_norm_linear(x2d, alpha, nbias, w, b, relu=False, eps=EPS,
                       out_dtype=jnp.float32, tm_pref=None, tn_pref=512):
    """Fused pre-LN + Linear with wide N: norm computed once per row tile and
    cached in a bf16 VMEM scratch across the N tiles."""
    M, E = x2d.shape
    _, N = w.shape
    tm = _pick_tile(M, tm_pref or TM_PREF, 8)
    tn = _pick_tile(N, tn_pref, 128)
    return pl.pallas_call(
        functools.partial(_norm_linear_kernel, eps=eps, relu=relu),
        out_shape=jax.ShapeDtypeStruct((M, N), out_dtype),
        grid=(M // tm, N // tn),
        in_specs=[
            pl.BlockSpec((tm, E), lambda i, j: (i, 0)),
            pl.BlockSpec((1, E), lambda i, j: (0, 0)),
            pl.BlockSpec((1, E), lambda i, j: (0, 0)),
            pl.BlockSpec((E, tn), lambda i, j: (0, j)),
            pl.BlockSpec((1, tn), lambda i, j: (0, j)),
        ],
        out_specs=pl.BlockSpec((tm, tn), lambda i, j: (i, j)),
        scratch_shapes=[pltpu.VMEM((tm, E), jnp.bfloat16)],
        compiler_params=pltpu.CompilerParams(
            dimension_semantics=("parallel", "arbitrary"),
            vmem_limit_bytes=VMEM_LIMIT),
    )(x2d, alpha.reshape(1, E), nbias.reshape(1, E), w, b.reshape(1, N))


# --- whole FFN sub-layer: pre-LN + l1 + ReLU + l2 + residual ------------------

def _ffn_kernel(x_ref, a_ref, c_ref, w1_ref, b1_ref, w2_ref, b2_ref,
                o_ref, acc_ref, xn_ref, *, eps):
    j = pl.program_id(1)

    @pl.when(j == 0)
    def _():
        acc_ref[...] = jnp.zeros_like(acc_ref)
        x = x_ref[...].astype(jnp.float32)
        mean = jnp.mean(x, axis=-1, keepdims=True)
        cen = x - mean
        var = jnp.sum(cen * cen, axis=-1, keepdims=True) / (x.shape[-1] - 1)
        xn_ref[...] = (a_ref[...] * (cen / (jnp.sqrt(var) + eps))
                       + c_ref[...]).astype(jnp.bfloat16)

    # hidden tile (tm, tdff) lives only in VMEM -- never written to HBM
    h = jnp.dot(xn_ref[...], w1_ref[...].astype(jnp.bfloat16),
                preferred_element_type=jnp.float32) + b1_ref[...]
    h = jnp.maximum(h, 0.0)
    acc_ref[...] += jnp.dot(h.astype(jnp.bfloat16), w2_ref[...].astype(jnp.bfloat16),
                            preferred_element_type=jnp.float32)

    @pl.when(j == pl.num_programs(1) - 1)
    def _():
        # out = x + l2(relu(l1(norm(x)))) : residual and final bias fused
        o_ref[...] = (x_ref[...].astype(jnp.float32) + acc_ref[...]
                      + b2_ref[...]).astype(o_ref.dtype)


def pallas_ffn_block(x2d, alpha, nbias, w1, b1, w2, b2, eps=EPS,
                     tm_pref=None, tdff_pref=512):
    """Whole FFN sub-layer (pre-LN + l1 + ReLU + l2 + residual) in one pallas_call."""
    M, E = x2d.shape
    d_ff = w1.shape[1]
    tm = _pick_tile(M, tm_pref or TM_PREF, 8)
    tf = _pick_tile(d_ff, tdff_pref, 128)
    return pl.pallas_call(
        functools.partial(_ffn_kernel, eps=eps),
        out_shape=jax.ShapeDtypeStruct((M, E), jnp.float32),
        grid=(M // tm, d_ff // tf),
        in_specs=[
            pl.BlockSpec((tm, E), lambda i, j: (i, 0)),
            pl.BlockSpec((1, E), lambda i, j: (0, 0)),
            pl.BlockSpec((1, E), lambda i, j: (0, 0)),
            pl.BlockSpec((E, tf), lambda i, j: (0, j)),
            pl.BlockSpec((1, tf), lambda i, j: (0, j)),
            pl.BlockSpec((tf, E), lambda i, j: (j, 0)),
            pl.BlockSpec((1, E), lambda i, j: (0, 0)),
        ],
        out_specs=pl.BlockSpec((tm, E), lambda i, j: (i, 0)),
        scratch_shapes=[pltpu.VMEM((tm, E), jnp.float32),
                        pltpu.VMEM((tm, E), jnp.bfloat16)],
        compiler_params=pltpu.CompilerParams(
            dimension_semantics=("parallel", "arbitrary"),
            vmem_limit_bytes=VMEM_LIMIT),
    )(x2d, alpha.reshape(1, E), nbias.reshape(1, E),
      w1, b1.reshape(1, d_ff), w2, b2.reshape(1, E))


# --- flash-style multi-head attention (Sk tiled, online softmax) --------------

def _attn_kernel(q_ref, k_ref, v_ref, m_ref, o_ref, m_scr, l_scr, acc_scr,
                 *, heads, scale):
    kv_step = pl.program_id(2)

    @pl.when(kv_step == 0)
    def _():
        m_scr[...] = jnp.full_like(m_scr, -jnp.inf)
        l_scr[...] = jnp.zeros_like(l_scr)
        acc_scr[...] = jnp.zeros_like(acc_scr)

    tq, E = q_ref.shape[1], q_ref.shape[2]
    tk = k_ref.shape[1]
    dk = E // heads
    q = q_ref[...].reshape(tq, E)
    kb = k_ref[...].reshape(tk, E)
    vb = v_ref[...].reshape(tk, E)
    mask = m_ref[...].reshape(m_ref.shape[1], tk)        # (1,tk) or (tq,tk); broadcasts
    is_masked = (mask == 0)

    # TODO(synk): per-head dk-wide dots underfill the 256-wide MXU on v6e/v7x; a
    # heads-batched (B*H, tq, dk) layout would fix that at the cost of external
    # transposes of Q/K/V.
    for h in range(heads):                               # static unroll; heads on lane slices
        sl = slice(h * dk, (h + 1) * dk)
        qh = (q[:, sl].astype(jnp.float32) * scale).astype(jnp.bfloat16)  # scale folded into q
        s = lax.dot_general(qh, kb[:, sl], (((1,), (1,)), ((), ())),
                            preferred_element_type=jnp.float32)
        s = jnp.where(is_masked, -1e9, s)                # masked_fill(mask == 0, -1e9)
        m_prev = m_scr[h]                                # (tq, 1) running max
        m_new = jnp.maximum(m_prev, jnp.max(s, axis=-1, keepdims=True))
        a = jnp.exp(m_prev - m_new)
        p = jnp.exp(s - m_new)
        l_scr[h] = a * l_scr[h] + jnp.sum(p, axis=-1, keepdims=True)
        acc_scr[:, sl] = (a * acc_scr[:, sl]
                          + jnp.dot(p.astype(jnp.bfloat16), vb[:, sl],
                                    preferred_element_type=jnp.float32))
        m_scr[h] = m_new

    @pl.when(kv_step == pl.num_programs(2) - 1)
    def _():
        parts = []
        for h in range(heads):
            inv = pl.reciprocal(l_scr[h], approx=True)   # EUP slot, essentially free
            parts.append(acc_scr[:, h * dk:(h + 1) * dk] * inv)
        # heads concatenated on the lane axis -> lane-dense (tq, E) store
        o_ref[...] = jnp.concatenate(parts, axis=-1).reshape(1, tq, E).astype(o_ref.dtype)


def pallas_attention(q, k, v, mask, heads, out_dtype=jnp.bfloat16,
                     tq_pref=256, tk_pref=512):
    """q: (B,Sq,E)  k,v: (B,Sk,E)  mask: (B,1,Sk) or (B,Sq,Sk) (0 = masked).
    Flash-style online softmax over Sk tiles; output (B,Sq,E), heads already
    concatenated on lanes (no transposes outside the kernel)."""
    B, Sq, E = q.shape
    Sk = k.shape[1]
    Mq = mask.shape[1]
    dk = E // heads
    scale = 1.0 / math.sqrt(dk)
    tq = _pick_tile(Sq, tq_pref, 8)
    tk = _pick_tile(Sk, tk_pref, 128)
    if Mq == 1:
        mask_spec = pl.BlockSpec((1, 1, tk), lambda b, i, kv: (b, 0, kv))
    else:
        mask_spec = pl.BlockSpec((1, tq, tk), lambda b, i, kv: (b, i, kv))
    return pl.pallas_call(
        functools.partial(_attn_kernel, heads=heads, scale=scale),
        out_shape=jax.ShapeDtypeStruct((B, Sq, E), out_dtype),
        grid=(B, Sq // tq, Sk // tk),
        in_specs=[
            pl.BlockSpec((1, tq, E), lambda b, i, kv: (b, i, 0)),
            pl.BlockSpec((1, tk, E), lambda b, i, kv: (b, kv, 0)),
            pl.BlockSpec((1, tk, E), lambda b, i, kv: (b, kv, 0)),
            mask_spec,
        ],
        out_specs=pl.BlockSpec((1, tq, E), lambda b, i, kv: (b, i, 0)),
        scratch_shapes=[
            pltpu.VMEM((heads, tq, 1), jnp.float32),     # running max per head
            pltpu.VMEM((heads, tq, 1), jnp.float32),     # running sum per head
            pltpu.VMEM((tq, E), jnp.float32),            # un-normalized output acc
        ],
        compiler_params=pltpu.CompilerParams(
            dimension_semantics=("parallel", "parallel", "arbitrary"),
            vmem_limit_bytes=VMEM_LIMIT),
    )(q, k, v, mask.astype(jnp.bfloat16))


# -------------------------- parameter construction -------------------------

def _init_linear(key, fan_in, fan_out):
    k1, k2 = jax.random.split(key)
    bound = 1.0 / math.sqrt(fan_in)
    w = jax.random.uniform(k1, (fan_in, fan_out), jnp.float32, -bound, bound)
    b = jax.random.uniform(k2, (fan_out,), jnp.float32, -bound, bound)
    return w, b


def init_norm(E):
    return {"alpha": jnp.ones((E,), jnp.float32), "bias": jnp.zeros((E,), jnp.float32)}


def init_mha(key, E):
    kq, kk, kv, ko = jax.random.split(key, 4)
    wq, bq = _init_linear(kq, E, E)
    wk, bk = _init_linear(kk, E, E)
    wv, bv = _init_linear(kv, E, E)
    wo, bo = _init_linear(ko, E, E)
    return {"w_q": wq.astype(jnp.bfloat16), "b_q": bq,
            "w_k": wk.astype(jnp.bfloat16), "b_k": bk,
            "w_v": wv.astype(jnp.bfloat16), "b_v": bv,
            "w_o": wo.astype(jnp.bfloat16), "b_o": bo}


def init_ff(key, E, d_ff):
    k1, k2 = jax.random.split(key)
    w1, b1 = _init_linear(k1, E, d_ff)
    w2, b2 = _init_linear(k2, d_ff, E)
    return {"w1": w1.astype(jnp.bfloat16), "b1": b1,
            "w2": w2.astype(jnp.bfloat16), "b2": b2}


def init_encoder_layer(key, E, d_ff):
    k1, k2 = jax.random.split(key)
    return {"norm1": init_norm(E), "norm2": init_norm(E),
            "attn": init_mha(k1, E), "ff": init_ff(k2, E, d_ff)}


def init_decoder_layer(key, E, d_ff):
    k1, k2, k3 = jax.random.split(key, 3)
    return {"norm1": init_norm(E), "norm2": init_norm(E), "norm3": init_norm(E),
            "attn1": init_mha(k1, E), "attn2": init_mha(k2, E),
            "ff": init_ff(k3, E, d_ff)}


def positional_encoding(max_seq_len, emb_dim):
    # Exactly reproduces the reference loop (including the 2*i exponent).
    pe = np.zeros((max_seq_len, emb_dim), dtype=np.float32)
    pos = np.arange(max_seq_len, dtype=np.float64)[:, None]
    i = np.arange(0, emb_dim, 2, dtype=np.float64)
    wavelength = 10000.0 ** (2.0 * i / emb_dim)
    pe[:, 0::2] = np.sin(pos / wavelength)
    pe[:, 1::2] = np.cos(pos / wavelength)
    return jnp.asarray(pe)


def init_transformer(key, in_vocab, out_vocab, emb_dim, d_ff, max_seq_len=3000):
    ke, kd, ko, kee, kde = jax.random.split(key, 5)
    pe = positional_encoding(max_seq_len, emb_dim)
    wo, bo = _init_linear(ko, emb_dim, out_vocab)
    enc = {
        "embed": jax.random.normal(kee, (in_vocab, emb_dim), jnp.float32),
        "pe": pe,
        # get_clones() deep-copies one initialized layer -> identical params per layer
        "layer": init_encoder_layer(ke, emb_dim, d_ff),
        "norm": init_norm(emb_dim),
    }
    dec = {
        "embed": jax.random.normal(kde, (out_vocab, emb_dim), jnp.float32),
        "pe": pe,
        "layer": init_decoder_layer(kd, emb_dim, d_ff),
        "norm": init_norm(emb_dim),
    }
    return {"encoder": enc, "decoder": dec,
            "out": {"w": wo.astype(jnp.bfloat16), "b": bo}}


# ------------------------------- forward pass -------------------------------

def self_attention_block(p_attn, p_norm, x, mask, heads):
    """x + W_o(attention(QKV(norm(x)))): multi-output norm+QKV (bf16 activations),
    flash attention, residual fused into the f32 output projection."""
    B, S, E = x.shape
    x2d = x.reshape(B * S, E)
    q, k, v = pallas_multi_proj(
        x2d, [p_attn["w_q"], p_attn["w_k"], p_attn["w_v"]],
        [p_attn["b_q"], p_attn["b_k"], p_attn["b_v"]],
        norm=(p_norm["alpha"], p_norm["bias"]))                         # bf16 (M,E) x3
    attn = pallas_attention(q.reshape(B, S, E), k.reshape(B, S, E),
                            v.reshape(B, S, E), mask, heads)            # bf16 (B,S,E)
    out = pallas_linear(attn.reshape(B * S, E), p_attn["w_o"], p_attn["b_o"],
                        residual=x2d)                                   # f32 residual stream
    return out.reshape(B, S, E)


def cross_attention_block(p_attn, p_norm, x, k_c, v_c, mask, heads):
    """K/V come precomputed (hoisted out of the decoder layer loop)."""
    B, St, E = x.shape
    x2d = x.reshape(B * St, E)
    (q,) = pallas_multi_proj(x2d, [p_attn["w_q"]], [p_attn["b_q"]],
                             norm=(p_norm["alpha"], p_norm["bias"]))
    attn = pallas_attention(q.reshape(B, St, E), k_c, v_c, mask, heads)
    out = pallas_linear(attn.reshape(B * St, E), p_attn["w_o"], p_attn["b_o"],
                        residual=x2d)
    return out.reshape(B, St, E)


def encoder_layer_forward(p, x, mask, heads):
    x = self_attention_block(p["attn"], p["norm1"], x, mask, heads)     # dropout = identity
    B, S, E = x.shape
    x = pallas_ffn_block(x.reshape(B * S, E), p["norm2"]["alpha"], p["norm2"]["bias"],
                         p["ff"]["w1"], p["ff"]["b1"], p["ff"]["w2"], p["ff"]["b2"])
    return x.reshape(B, S, E)


def decoder_layer_forward(p, x, k_c, v_c, src_mask, trg_mask, heads):
    x = self_attention_block(p["attn1"], p["norm1"], x, trg_mask, heads)
    x = cross_attention_block(p["attn2"], p["norm2"], x, k_c, v_c, src_mask, heads)
    B, S, E = x.shape
    x = pallas_ffn_block(x.reshape(B * S, E), p["norm3"]["alpha"], p["norm3"]["bias"],
                         p["ff"]["w1"], p["ff"]["b1"], p["ff"]["w2"], p["ff"]["b2"])
    return x.reshape(B, S, E)


def encoder_forward(p, src_seq, src_mask, heads, n_layers):
    E = p["embed"].shape[1]
    B, S = src_seq.shape
    # TODO(synk): embedding gather + positional-encoding add kept in XLA glue.
    x = jnp.take(p["embed"], src_seq, axis=0)
    x = x * math.sqrt(E) + p["pe"][:S][None, :, :]
    for _ in range(n_layers):                                           # cloned layers share weights
        x = encoder_layer_forward(p["layer"], x, src_mask, heads)
    e = pallas_norm(x.reshape(B * S, E), p["norm"]["alpha"], p["norm"]["bias"],
                    out_dtype=jnp.bfloat16)
    return e.reshape(B, S, E)


def decoder_forward(p, trg_seq, trg_mask, e_out, src_mask, heads, n_layers):
    E = p["embed"].shape[1]
    B, S = trg_seq.shape
    x = jnp.take(p["embed"], trg_seq, axis=0)
    x = x * math.sqrt(E) + p["pe"][:S][None, :, :]
    # Cross-attention K/V depend only on e_out and the (shared, cloned) layer
    # weights -> compute once and reuse across all decoder layers.
    attn2 = p["layer"]["attn2"]
    Ss = e_out.shape[1]
    e2d = e_out.reshape(B * Ss, E)
    k_c, v_c = pallas_multi_proj(e2d, [attn2["w_k"], attn2["w_v"]],
                                 [attn2["b_k"], attn2["b_v"]])
    k_c = k_c.reshape(B, Ss, E)
    v_c = v_c.reshape(B, Ss, E)
    for _ in range(n_layers):
        x = decoder_layer_forward(p["layer"], x, k_c, v_c, src_mask, trg_mask, heads)
    return x          # final Norm is fused into the output projection (identical math)


def transformer_forward(params, src_seq, src_mask, trg_seq, trg_mask, heads, n_layers):
    e_output = encoder_forward(params["encoder"], src_seq, src_mask, heads, n_layers)
    d_pre = decoder_forward(params["decoder"], trg_seq, trg_mask, e_output,
                            src_mask, heads, n_layers)
    B, St, E = d_pre.shape
    dn = params["decoder"]["norm"]
    # out = Linear(Norm(decoder_output)) -- norm fused into the projection kernel,
    # normalized tile cached in VMEM across vocab tiles.
    logits = pallas_norm_linear(d_pre.reshape(B * St, E), dn["alpha"], dn["bias"],
                                params["out"]["w"], params["out"]["b"])
    return logits.reshape(B, St, -1)


# ----------------------------------- main -----------------------------------

if __name__ == "__main__":
    # Small deterministic config.
    in_vocab, out_vocab = 11, 13
    emb_dim, n_layers, heads = 32, 2, 4
    d_ff = 2048            # canonical FeedForward default
    B, S_src, S_trg = 2, 8, 8

    root = jax.random.PRNGKey(0)
    k_params, k_src, k_trg = jax.random.split(root, 3)

    params = init_transformer(k_params, in_vocab, out_vocab, emb_dim, d_ff,
                              max_seq_len=64)

    src_seq = jax.random.randint(k_src, (B, S_src), 0, in_vocab, dtype=jnp.int32)
    trg_seq = jax.random.randint(k_trg, (B, S_trg), 0, out_vocab, dtype=jnp.int32)
    # src_mask: (B, 1, S_src); trg_mask: (B, S_trg, S_trg) no-peek (causal) mask.
    src_mask = jnp.ones((B, 1, S_src), jnp.float32)
    trg_mask = jnp.broadcast_to(
        jnp.tril(jnp.ones((S_trg, S_trg), jnp.float32))[None], (B, S_trg, S_trg))

    out = transformer_forward(params, src_seq, src_mask, trg_seq, trg_mask,
                              heads, n_layers)
    out = jax.block_until_ready(out)
    assert out.shape == (B, S_trg, out_vocab), out.shape
    assert bool(jnp.all(jnp.isfinite(out)))
    print("KERNEL_OK")
</pallas_src>

<mosaic_0001>
module attributes {stable_mosaic.version = 11 : i64} {
  func.func @_multi_proj_kernel(%arg0: i32, %arg1: memref<16x32xf32, #tpu.memory_space<vmem>>, %arg2: memref<1x32xf32, #tpu.memory_space<vmem>>, %arg3: memref<1x32xf32, #tpu.memory_space<vmem>>, %arg4: memref<32x32xbf16, #tpu.memory_space<vmem>>, %arg5: memref<32x32xbf16, #tpu.memory_space<vmem>>, %arg6: memref<32x32xbf16, #tpu.memory_space<vmem>>, %arg7: memref<1x32xf32, #tpu.memory_space<vmem>>, %arg8: memref<1x32xf32, #tpu.memory_space<vmem>>, %arg9: memref<1x32xf32, #tpu.memory_space<vmem>>, %arg10: memref<16x32xbf16, #tpu.memory_space<vmem>>, %arg11: memref<16x32xbf16, #tpu.memory_space<vmem>>, %arg12: memref<16x32xbf16, #tpu.memory_space<vmem>>) attributes {dimension_semantics = [#tpu.dimension_semantics<parallel>], iteration_bounds = array<i64: 1>, scalar_prefetch = 0 : i64, scratch_operands = 0 : i64, tpu.core_type = #tpu.core_type<tc>, window_params = [{transform_indices = @transform_0, window_bounds = array<i64: 16, 32>}, {pipeline_mode = #tpu.pipeline_mode<synchronous>, transform_indices = @transform_1, window_bounds = array<i64: 1, 32>}, {pipeline_mode = #tpu.pipeline_mode<synchronous>, transform_indices = @transform_2, window_bounds = array<i64: 1, 32>}, {pipeline_mode = #tpu.pipeline_mode<synchronous>, transform_indices = @transform_3, window_bounds = array<i64: 32, 32>}, {pipeline_mode = #tpu.pipeline_mode<synchronous>, transform_indices = @transform_4, window_bounds = array<i64: 32, 32>}, {pipeline_mode = #tpu.pipeline_mode<synchronous>, transform_indices = @transform_5, window_bounds = array<i64: 32, 32>}, {pipeline_mode = #tpu.pipeline_mode<synchronous>, transform_indices = @transform_6, window_bounds = array<i64: 1, 32>}, {pipeline_mode = #tpu.pipeline_mode<synchronous>, transform_indices = @transform_7, window_bounds = array<i64: 1, 32>}, {pipeline_mode = #tpu.pipeline_mode<synchronous>, transform_indices = @transform_8, window_bounds = array<i64: 1, 32>}, {transform_indices = @transform_9, window_bounds = array<i64: 16, 32>}, {transform_indices = @transform_10, window_bounds = array<i64: 16, 32>}, {transform_indices = @transform_11, window_bounds = array<i64: 16, 32>}]} {
    %c0 = arith.constant 0 : index
    %c0_0 = arith.constant 0 : index
    %0 = vector.load %arg1[%c0, %c0_0] : memref<16x32xf32, #tpu.memory_space<vmem>>, vector<16x32xf32>
    %cst = arith.constant dense<0.000000e+00> : vector<16xf32>
    %1 = vector.multi_reduction <add>, %0, %cst [1] : vector<16x32xf32> to vector<16xf32>
    %2 = vector.shape_cast %1 : vector<16xf32> to vector<16x1xf32>
    %cst_1 = arith.constant 3.200000e+01 : f32
    %3 = vector.broadcast %cst_1 : f32 to vector<16x1xf32>
    %4 = arith.divf %2, %3 : vector<16x1xf32>
    %5 = vector.broadcast %4 : vector<16x1xf32> to vector<16x32xf32>
    %6 = arith.subf %0, %5 : vector<16x32xf32>
    %7 = arith.mulf %6, %6 : vector<16x32xf32>
    %cst_2 = arith.constant dense<0.000000e+00> : vector<16xf32>
    %8 = vector.multi_reduction <add>, %7, %cst_2 [1] : vector<16x32xf32> to vector<16xf32>
    %9 = vector.shape_cast %8 : vector<16xf32> to vector<16x1xf32>
    %cst_3 = arith.constant 3.100000e+01 : f32
    %10 = vector.broadcast %cst_3 : f32 to vector<16x1xf32>
    %11 = arith.divf %9, %10 : vector<16x1xf32>
    %c0_4 = arith.constant 0 : index
    %c0_5 = arith.constant 0 : index
    %12 = vector.load %arg2[%c0_4, %c0_5] : memref<1x32xf32, #tpu.memory_space<vmem>>, vector<1x32xf32>
    %13 = math.sqrt %11 : vector<16x1xf32>
    %cst_6 = arith.constant 9.99999997E-7 : f32
    %14 = vector.broadcast %cst_6 : f32 to vector<16x1xf32>
    %15 = arith.addf %13, %14 : vector<16x1xf32>
    %16 = vector.broadcast %15 : vector<16x1xf32> to vector<16x32xf32>
    %17 = arith.divf %6, %16 : vector<16x32xf32>
    %18 = vector.broadcast %12 : vector<1x32xf32> to vector<16x32xf32>
    %19 = arith.mulf %18, %17 : vector<16x32xf32>
    %c0_7 = arith.constant 0 : index
    %c0_8 = arith.constant 0 : index
    %20 = vector.load %arg3[%c0_7, %c0_8] : memref<1x32xf32, #tpu.memory_space<vmem>>, vector<1x32xf32>
    %21 = vector.broadcast %20 : vector<1x32xf32> to vector<16x32xf32>
    %22 = arith.addf %19, %21 : vector<16x32xf32>
    %23 = arith.truncf %22 : vector<16x32xf32> to vector<16x32xbf16>
    %c0_9 = arith.constant 0 : index
    %c0_10 = arith.constant 0 : index
    %24 = vector.load %arg4[%c0_9, %c0_10] : memref<32x32xbf16, #tpu.memory_space<vmem>>, vector<32x32xbf16>
    %cst_11 = arith.constant dense<0.000000e+00> : vector<16x32xf32>
    %25 = tpu.matmul %23, %24, %cst_11 {dimension_numbers = #tpu.dot_dimension_numbers<[1], [0], [0], [1], [0, 0, 1, 1], [], []>} : vector<16x32xbf16>, vector<32x32xbf16>, vector<16x32xf32> -> vector<16x32xf32>
    %c0_12 = arith.constant 0 : index
    %c0_13 = arith.constant 0 : index
    %26 = vector.load %arg7[%c0_12, %c0_13] : memref<1x32xf32, #tpu.memory_space<vmem>>, vector<1x32xf32>
    %27 = vector.broadcast %26 : vector<1x32xf32> to vector<16x32xf32>
    %28 = arith.addf %25, %27 : vector<16x32xf32>
    %29 = arith.truncf %28 : vector<16x32xf32> to vector<16x32xbf16>
    %c0_14 = arith.constant 0 : index
    %c0_15 = arith.constant 0 : index
    %30 = vector.load %arg10[%c0_14, %c0_15] : memref<16x32xbf16, #tpu.memory_space<vmem>>, vector<16x32xbf16>
    tpu.vector_store %arg10[%c0_14, %c0_15], %29 {strides = array<i32>} : memref<16x32xbf16, #tpu.memory_space<vmem>>, vector<16x32xbf16>,
    %c0_16 = arith.constant 0 : index
    %c0_17 = arith.constant 0 : index
    %31 = vector.load %arg5[%c0_16, %c0_17] : memref<32x32xbf16, #tpu.memory_space<vmem>>, vector<32x32xbf16>
    %cst_18 = arith.constant dense<0.000000e+00> : vector<16x32xf32>
    %32 = tpu.matmul %23, %31, %cst_18 {dimension_numbers = #tpu.dot_dimension_numbers<[1], [0], [0], [1], [0, 0, 1, 1], [], []>} : vector<16x32xbf16>, vector<32x32xbf16>, vector<16x32xf32> -> vector<16x32xf32>
    %c0_19 = arith.constant 0 : index
    %c0_20 = arith.constant 0 : index
    %33 = vector.load %arg8[%c0_19, %c0_20] : memref<1x32xf32, #tpu.memory_space<vmem>>, vector<1x32xf32>
    %34 = vector.broadcast %33 : vector<1x32xf32> to vector<16x32xf32>
    %35 = arith.addf %32, %34 : vector<16x32xf32>
    %36 = arith.truncf %35 : vector<16x32xf32> to vector<16x32xbf16>
    %c0_21 = arith.constant 0 : index
    %c0_22 = arith.constant 0 : index
    %37 = vector.load %arg11[%c0_21, %c0_22] : memref<16x32xbf16, #tpu.memory_space<vmem>>, vector<16x32xbf16>
    tpu.vector_store %arg11[%c0_21, %c0_22], %36 {strides = array<i32>} : memref<16x32xbf16, #tpu.memory_space<vmem>>, vector<16x32xbf16>,
    %c0_23 = arith.constant 0 : index
    %c0_24 = arith.constant 0 : index
    %38 = vector.load %arg6[%c0_23, %c0_24] : memref<32x32xbf16, #tpu.memory_space<vmem>>, vector<32x32xbf16>
    %cst_25 = arith.constant dense<0.000000e+00> : vector<16x32xf32>
    %39 = tpu.matmul %23, %38, %cst_25 {dimension_numbers = #tpu.dot_dimension_numbers<[1], [0], [0], [1], [0, 0, 1, 1], [], []>} : vector<16x32xbf16>, vector<32x32xbf16>, vector<16x32xf32> -> vector<16x32xf32>
    %c0_26 = arith.constant 0 : index
    %c0_27 = arith.constant 0 : index
    %40 = vector.load %arg9[%c0_26, %c0_27] : memref<1x32xf32, #tpu.memory_space<vmem>>, vector<1x32xf32>
    %41 = vector.broadcast %40 : vector<1x32xf32> to vector<16x32xf32>
    %42 = arith.addf %39, %41 : vector<16x32xf32>
    %43 = arith.truncf %42 : vector<16x32xf32> to vector<16x32xbf16>
    %c0_28 = arith.constant 0 : index
    %c0_29 = arith.constant 0 : index
    %44 = vector.load %arg12[%c0_28, %c0_29] : memref<16x32xbf16, #tpu.memory_space<vmem>>, vector<16x32xbf16>
    tpu.vector_store %arg12[%c0_28, %c0_29], %43 {strides = array<i32>} : memref<16x32xbf16, #tpu.memory_space<vmem>>, vector<16x32xbf16>,
    return
  }
  func.func @transform_0(%arg0: i32) -> (i32, i32) {
    %c0_i32 = arith.constant 0 : i32
    %c0_i32_0 = arith.constant 0 : i32
    return %arg0, %c0_i32 : i32, i32
  }
  func.func @transform_1(%arg0: i32) -> (i32, i32) {
    %c0_i32 = arith.constant 0 : i32
    %c0_i32_0 = arith.constant 0 : i32
    %c0_i32_1 = arith.constant 0 : i32
    return %c0_i32, %c0_i32_0 : i32, i32
  }
  func.func @transform_2(%arg0: i32) -> (i32, i32) {
    %c0_i32 = arith.constant 0 : i32
    %c0_i32_0 = arith.constant 0 : i32
    %c0_i32_1 = arith.constant 0 : i32
    return %c0_i32, %c0_i32_0 : i32, i32
  }
  func.func @transform_3(%arg0: i32) -> (i32, i32) {
    %c0_i32 = arith.constant 0 : i32
    %c0_i32_0 = arith.constant 0 : i32
    %c0_i32_1 = arith.constant 0 : i32
    return %c0_i32, %c0_i32_0 : i32, i32
  }
  func.func @transform_4(%arg0: i32) -> (i32, i32) {
    %c0_i32 = arith.constant 0 : i32
    %c0_i32_0 = arith.constant 0 : i32
    %c0_i32_1 = arith.constant 0 : i32
    return %c0_i32, %c0_i32_0 : i32, i32
  }
  func.func @transform_5(%arg0: i32) -> (i32, i32) {
    %c0_i32 = arith.constant 0 : i32
    %c0_i32_0 = arith.constant 0 : i32
    %c0_i32_1 = arith.constant 0 : i32
    return %c0_i32, %c0_i32_0 : i32, i32
  }
  func.func @transform_6(%arg0: i32) -> (i32, i32) {
    %c0_i32 = arith.constant 0 : i32
    %c0_i32_0 = arith.constant 0 : i32
    %c0_i32_1 = arith.constant 0 : i32
    return %c0_i32, %c0_i32_0 : i32, i32
  }
  func.func @transform_7(%arg0: i32) -> (i32, i32) {
    %c0_i32 = arith.constant 0 : i32
    %c0_i32_0 = arith.constant 0 : i32
    %c0_i32_1 = arith.constant 0 : i32
    return %c0_i32, %c0_i32_0 : i32, i32
  }
  func.func @transform_8(%arg0: i32) -> (i32, i32) {
    %c0_i32 = arith.constant 0 : i32
    %c0_i32_0 = arith.constant 0 : i32
    %c0_i32_1 = arith.constant 0 : i32
    return %c0_i32, %c0_i32_0 : i32, i32
  }
  func.func @transform_9(%arg0: i32) -> (i32, i32) {
    %c0_i32 = arith.constant 0 : i32
    %c0_i32_0 = arith.constant 0 : i32
    return %arg0, %c0_i32 : i32, i32
  }
  func.func @transform_10(%arg0: i32) -> (i32, i32) {
    %c0_i32 = arith.constant 0 : i32
    %c0_i32_0 = arith.constant 0 : i32
    return %arg0, %c0_i32 : i32, i32
  }
  func.func @transform_11(%arg0: i32) -> (i32, i32) {
    %c0_i32 = arith.constant 0 : i32
    %c0_i32_0 = arith.constant 0 : i32
    return %arg0, %c0_i32 : i32, i32
  }
}

</mosaic_0001>

<bundles_post_ra>
// kernel: tpu_custom_call.1
= control target key start
LH: loop header
LB: loop body
LE: loop exit
PB: predicated region body
PF: predicated region fallthrough
CT: control target
= control target key end

     0   :  { %17 = vsyncpa [#allocation3], 0  ;;  %s846_s0 = inlined_call_operand.hbm [shape: f32[16,32], index: 0, kind: input, shape index: {}]   ;;  %s847_s1 = inlined_call_operand.vmem [shape: f32[1,32], index: 1, kind: input, shape index: {}]   ;;  %s848_s2 = inlined_call_operand.vmem [shape: f32[1,32], index: 2, kind: input, shape index: {}]   ;;  %s849_s3 = inlined_call_operand.hbm [shape: bf16[32,32], index: 3, kind: input, shape index: {}]   ;;  %s850_s4 = inlined_call_operand.hbm [shape: bf16[32,32], index: 4, kind: input, shape index: {}]   ;;  %s851_s5 = inlined_call_operand.vmem [shape: bf16[32,32], index: 5, kind: input, shape index: {}]   ;;  %s852_s6 = inlined_call_operand.vmem [shape: f32[1,32], index: 6, kind: input, shape index: {}]   ;;  %s853_s7 = inlined_call_operand.vmem [shape: f32[1,32], index: 7, kind: input, shape index: {}]   ;;  %s854_s8 = inlined_call_operand.vmem [shape: f32[1,32], index: 8, kind: input, shape index: {}]   ;;  %s855_s9 = inlined_call_operand.hbm [shape: bf16[16,32], index: 9, kind: output, shape index: {0}]   ;;  %s856_s10 = inlined_call_operand.hbm [shape: bf16[16,32], index: 10, kind: output, shape index: {1}]   ;;  %s857_s11 = inlined_call_operand.hbm [shape: bf16[16,32], index: 11, kind: output, shape index: {2}]  }
   0x1   :  { %18 = vsyncpa [#allocation6], 0 }
   0x2   :  { %19 = vsyncpa [#allocation4], 0 }
   0x3   :  { %20 = vsyncpa [#allocation10], 0  ;;  %s643_s17 = smov [#allocation5]   ;;  %s503_s21 = scalar_lea.hbm %s849_s3, 256 }
   0x4   :  { %s42_s18 = sshll.u32 %s643_s17, 4  ;;  %p504_p0 = scmp.ne.s32.totalorder %s849_s3, %s503_s21  ;;  %s43_s18 = int_to_ptr.vmem [resolvable:$true] %s42_s18 }
   0x5   :  { %p507_p1 = scmp.lt.u32.totalorder %s503_s21, %s849_s3 }
   0x7   :  { %p509_p2 = pnand %p507_p1, %p504_p0 }
   0x9   :  { %512 = shalt.err (!%p509_p2)
}
   0xa   :  { %s513_s26 = scalar_lea.vmem %s43_s18, 256  ;;  %p518_p4 = scmp.lt.s32.totalorder %s43_s18, %s43_s18 }
   0xb   :  { %p514_p3 = scmp.ne.s32.totalorder %s43_s18, %s513_s26  ;;  %p519_p5 = scmp.lt.s32.totalorder %s513_s26, %s513_s26 }
   0xd   :  { %p520_p6 = por %p519_p5, %p518_p4 }
   0xf   :  { %p521_p7 = pnand %p520_p6, %p514_p3 }
  0x11   :  { %524 = shalt.err (!%p521_p7)
}
  0x12   :  { %s644_s27 = smov 64   ;;  %s645_s28 = smov 4  }
  0x13   :  { %48 = dma.hbm_to_vmem [thread:$0]  %s849_s3, 256, %s43_s18, [#allocation6], %s644_s27, %s644_s27, %s645_s28  }
  0x14   :  { %s646_s12 = smov [#allocation2]   ;;  %s525_s16 = scalar_lea.hbm %s846_s0, 256 }
  0x15   :  { %s26_s13 = sshll.u32 %s646_s12, 4  ;;  %p526_p8 = scmp.ne.s32.totalorder %s846_s0, %s525_s16  ;;  %s27_s13 = int_to_ptr.vmem [resolvable:$true] %s26_s13 }
  0x16   :  { %p529_p9 = scmp.lt.u32.totalorder %s525_s16, %s846_s0 }
  0x18   :  { %p531_p10 = pnand %p529_p9, %p526_p8 }
  0x1a   :  { %534 = shalt.err (!%p531_p10)
}
  0x1b   :  { %s535_s22 = scalar_lea.vmem %s27_s13, 256  ;;  %p540_p12 = scmp.lt.s32.totalorder %s27_s13, %s27_s13 }
  0x1c   :  { %p536_p11 = scmp.ne.s32.totalorder %s27_s13, %s535_s22  ;;  %p541_p13 = scmp.lt.s32.totalorder %s535_s22, %s535_s22 }
  0x1e   :  { %p542_p0 = por %p541_p13, %p540_p12 }
  0x20   :  { %p543_p1 = pnand %p542_p0, %p536_p11 }
  0x22   :  { %546 = shalt.err (!%p543_p1)
}
  0x23   :  { %s647_s3 = smov 128   ;;  %s648_s18 = smov 8  }
  0x24   :  { %32 = dma.hbm_to_vmem [thread:$0]  %s846_s0, 256, %s27_s13, [#allocation3], %s647_s3, %s647_s3, %s648_s18  }
  0x25   :  { %s649_s25 = smov [#allocation7]   ;;  %s547_s12 = scalar_lea.hbm %s850_s4, 256 }
  0x26   :  { %s54_s26 = sshll.u32 %s649_s25, 4  ;;  %p548_p2 = scmp.ne.s32.totalorder %s850_s4, %s547_s12  ;;  %s55_s26 = int_to_ptr.vmem [resolvable:$true] %s54_s26 }
  0x27   :  { %p551_p3 = scmp.lt.u32.totalorder %s547_s12, %s850_s4 }
  0x29   :  { %p553_p4 = pnand %p551_p3, %p548_p2 }
  0x2b   :  { %556 = shalt.err (!%p553_p4)
}
  0x2c   :  { %s557_s19 = scalar_lea.vmem %s55_s26, 256  ;;  %p562_p6 = scmp.lt.s32.totalorder %s55_s26, %s55_s26 }
  0x2d   :  { %p558_p5 = scmp.ne.s32.totalorder %s55_s26, %s557_s19  ;;  %p563_p7 = scmp.lt.s32.totalorder %s557_s19, %s557_s19 }
  0x2f   :  { %p564_p8 = por %p563_p7, %p562_p6 }
  0x31   :  { %p565_p9 = pnand %p564_p8, %p558_p5 }
  0x33   :  { %568 = shalt.err (!%p565_p9)
}
  0x34   :  { %60 = dma.hbm_to_vmem [thread:$0]  %s850_s4, 256, %s55_s26, [#allocation6], %s644_s27, %s644_s27, %s645_s28  }
  0x35   :  { %635 = dma.done.wait [#allocation3], 256  }
  0x36   :  { %636 = vsyncadd [#allocation3], 4294967040 }
  0x37   :  { %637 = dma.done.wait [#allocation6], 512  }
  0x38   :  { %638 = vsyncadd [#allocation6], 4294966784  ;;  %vm81_vm0 = vcmask 261120   ;;  %v79_v0 = vld [vmem:[#allocation2] sm:$0xff]  ;;  %v80_v1 = vld [vmem:[#allocation2 + $0x8] sm:$0xff]  ;;  %v650_v16 = vmov 0.0  }
  0x39   :  { %v82_v2 = vsel %vm81_vm0, %v79_v0, 0.0  ;;  %v85_v3 = vsel %vm81_vm0, %v80_v1, 0.0  ;;  %v489_v14 = vld [vmem:[#allocation5] sm:$0xff]   ;;  %v490_v15 = vld [vmem:[#allocation7] sm:$0xff]   ;;  %453 = vmatprep.subr.bf16.mxu0 %v650_v16  ;;  %461 = vmatprep.subr.bf16.mxu1 %v650_v16  ;;  %v491_v17 = vld [vmem:[#allocation5 + $0x8] sm:$0xff]   ;;  %vm651_vm1 = vmmov 0  }
  0x3a   :  { %83 = vadd.xlane.f32.xlu0 %v82_v2  ;;  %454 = vmatpush3.bf16.msra.mxu0 %v489_v14  ;;  %v492_v18 = vld [vmem:[#allocation7 + $0x8] sm:$0xff]   ;;  %v418_v37 = vld [vmem:[%s847_s1] ss:$0 sm:$0xff]  ;;  %vm218_vm6 = vcmask 257024  }
  0x3b   :  { %462 = vmatpush3.bf16.msra.mxu1 %v490_v15  ;;  %455 = vmatprep.subr.bf16.mxu0 %v650_v16  ;;  %v419_v41 = vld [vmem:[%s848_s2] ss:$0 sm:$0xff]  ;;  %v494_v47 = vld [vmem:[%s851_s5 + $0x8] sm:$0xff]  }
  0x3c   :  { %463 = vmatprep.subr.bf16.mxu1 %v650_v16  ;;  %457 = vmatprep.mubr.msk.bf16.mxu0 %vm651_vm1, %v650_v16  ;;  %v493_v45 = vld [vmem:[%s851_s5] sm:$0xff]   ;;  %s652_s5 = smov [#allocation9]  }
  0x3d   :  { %465 = vmatprep.mubr.msk.bf16.mxu1 %vm651_vm1, %v650_v16  ;;  %v420_v48 = vld [vmem:[%s852_s6] ss:$0 sm:$0xff]  ;;  %s386_s29 = sshll.u32 %s652_s5, 4  ;;  %s653_s6 = smov [#allocation8]   ;;  %s387_s29 = int_to_ptr.vmem [resolvable:$true] %s386_s29 }
  0x3e   :  { %86 = vadd.xlane.f32.xlu0 %v85_v3  ;;  %456 = vmatpush3.bf16.msra.mxu0 %v491_v17  ;;  %v426_v49 = vld [vmem:[%s853_s7] ss:$0 sm:$0xff]  ;;  %s374_s30 = sshll.u32 %s653_s6, 4  ;;  %s569_s14 = scalar_lea.vmem %s387_s29, 128  ;;  %s790_s30 = int_to_ptr.vmem [resolvable:$true] %s374_s30 }
  0x3f   :  { %464 = vmatpush3.bf16.msra.mxu1 %v492_v18  ;;  %469 = vmatprep.subr.bf16.mxu0 %v650_v16  ;;  %v432_v2 = vld [vmem:[%s854_s8] ss:$0 sm:$0xff]  ;;  %p570_p10 = scmp.ne.s32.totalorder %s387_s29, %s569_s14  ;;  %p574_p11 = scmp.lt.s32.totalorder %s387_s29, %s387_s29 }
  0x40   :  { %p575_p12 = scmp.lt.s32.totalorder %s569_s14, %s569_s14 }
  0x42   :  { %p576_p13 = por %p575_p12, %p574_p11 }
  0x44   :  { %p577_p0 = pnand %p576_p13, %p570_p10 }
  0xc7   :  { %v84_v4 = vpop.xlane.xlu0 %83 }
  0xc8   :  { %v89_v5 = vmul.f32 0.03125, %v84_v4 }
  0xca   :  { %v91_v6 = vsub.f32 %v79_v0, %v89_v5 }
  0xcb   :  { %v87_v7 = vpop.xlane.xlu0 %86 }
  0xcc   :  { %v90_v8 = vmul.f32 0.03125, %v87_v7  ;;  %v93_v9 = vmul.f32 %v91_v6, %v91_v6 }
  0xce   :  { %v92_v10 = vsub.f32 %v80_v1, %v90_v8  ;;  %v95_v11 = vsel %vm81_vm0, %v93_v9, 0.0 }
  0xcf   :  { %96 = vadd.xlane.f32.xlu1 %v95_v11 }
  0xd0   :  { %v94_v12 = vmul.f32 %v92_v10, %v92_v10 }
  0xd2   :  { %v98_v13 = vsel %vm81_vm0, %v94_v12, 0.0 }
  0xd3   :  { %99 = vadd.xlane.f32.xlu1 %v98_v13 }
 0x15c   :  { %v97_v19 = vpop.xlane.xlu1 %96 }
 0x15d   :  { %v102_v20 = vmul.f32 0.032258064, %v97_v19 }
 0x15f   :  { %495 = vrsqrt.f32 %v102_v20  ;;  %vm107_vm2 = vcmp.eq.f32.partialorder %v102_v20, inf  ;;  %v110_v25 = vand.u32 2147483648, %v102_v20  ;;  %vm109_vm3 = vcmp.eq.f32.partialorder %v102_v20, 0.0 }
 0x160   :  { %v100_v21 = vpop.xlane.xlu1 %99 }
 0x161   :  { %v103_v22 = vmul.f32 0.032258064, %v100_v21 }
 0x163   :  { %497 = vrsqrt.f32 %v103_v22  ;;  %vm114_vm4 = vcmp.eq.f32.partialorder %v103_v22, inf  ;;  %v117_v31 = vand.u32 2147483648, %v103_v22  ;;  %vm116_vm5 = vcmp.eq.f32.partialorder %v103_v22, 0.0 }
 0x169   :  { %v496_v23 = vpop.eup %495 }
 0x16a   :  { %v106_v24 = vmul.f32 %v496_v23, %v102_v20 }
 0x16c   :  { %v108_v26 = vsel %vm107_vm2, %v102_v20, %v106_v24 }
 0x16d   :  { %v498_v27 = vpop.eup %497  ;;  %v111_v28 = vsel %vm109_vm3, %v110_v25, %v108_v26 }
 0x16e   :  { %v119_v29 = vadd.f32 1e-06, %v111_v28  ;;  %v113_v30 = vmul.f32 %v498_v27, %v103_v22 }
 0x170   :  { %499 = vrcp.f32 %v119_v29  ;;  %v115_v32 = vsel %vm114_vm4, %v103_v22, %v113_v30 }
 0x171   :  { %v118_v33 = vsel %vm116_vm5, %v117_v31, %v115_v32 }
 0x172   :  { %v120_v34 = vadd.f32 1e-06, %v118_v33 }
 0x174   :  { %501 = vrcp.f32 %v120_v34 }
 0x17a   :  { %v500_v35 = vpop.eup %499 }
 0x17b   :  { %v122_v36 = vmul.f32 %v500_v35, %v91_v6 }
 0x17d   :  { %v131_v40 = vmul.f32 %v418_v37, %v122_v36 }
 0x17e   :  { %v502_v38 = vpop.eup %501 }
 0x17f   :  { %v124_v39 = vmul.f32 %v502_v38, %v92_v10  ;;  %v140_v43 = vadd.f32 %v419_v41, %v131_v40 }
 0x181   :  { %v132_v42 = vmul.f32 %v418_v37, %v124_v39 }
 0x183   :  { %v141_v44 = vadd.f32 %v419_v41, %v132_v42 }
 0x185   :  { %v142_v46 = vpack.c.bf16 %v141_v44, %v140_v43 }
 0x187   :  { %458 = vmatmul.mubr.msk.bf16.vlgmr.msra.gmra.mrb[0].mxu0 %vm81_vm0, %v142_v46  ;;  %466 = vmatmul.mubr.msk.bf16.vlgmr.msra.gmra.mrb[0].mxu1 %vm81_vm0, %v142_v46 }
 0x188   :  { %470 = vmatpush3.bf16.msra.mxu0 %v493_v45  ;;  %473 = vmatprep.mubr.msk.bf16.mxu0 %vm651_vm1, %v650_v16 }
 0x189   :  { %471 = vmatprep.subr.bf16.mxu0 %v650_v16 }
 0x18c   :  { %472 = vmatpush3.bf16.msra.mxu0 %v494_v47 }
 0x18f   :  { %474 = vmatmul.mubr.msk.bf16.vlgmr.msra.gmra.mrb[4].mxu0 %vm81_vm0, %v142_v46 }
 0x25a   :  { %v203_v50 = vpop.f32.mrb[0].mxu0  ;;  %v278_v51 = vpop.f32.mrb[0].mxu1 }
 0x25b   :  { %v204_v52 = vadd.f32 %v420_v48, %v203_v50  ;;  %v279_v53 = vadd.f32 %v426_v49, %v278_v51  ;;  %v459_v54 = vpop.f32.mrb[1].mxu0  ;;  %v467_v55 = vpop.f32.mrb[1].mxu1 }
 0x25c   :  { %v206_v56 = vpop.f32.mrb[2].mxu0  ;;  %v281_v57 = vpop.f32.mrb[2].mxu1 }
 0x25d   :  { %v438_v58 = vpack.c.bf16 %v204_v52, %v204_v52  ;;  %v440_v59 = vpack.c.bf16 %v279_v53, %v279_v53  ;;  %v207_v60 = vadd.f32 %v420_v48, %v206_v56  ;;  %v282_v61 = vadd.f32 %v426_v49, %v281_v57  ;;  %v460_v62 = vpop.f32.mrb[3].mxu0  ;;  %v468_v63 = vpop.f32.mrb[3].mxu1 }
 0x25f   :  { %v439_v0 = vpack.c.bf16 %v207_v60, %v207_v60  ;;  %v441_v1 = vpack.c.bf16 %v282_v61, %v282_v61  ;;  %219 = vst.msk [vmem:[#allocation8] sm:$0xf] %vm218_vm6, %v438_v58  ;;  %293 = vst.msk [vmem:[#allocation9] sm:$0xf] %vm218_vm6, %v440_v59 }
 0x261   :  { %220 = vst.msk [vmem:[#allocation8 + $0x4] sm:$0xf] %vm218_vm6, %v439_v0  ;;  %294 = vst.msk [vmem:[#allocation9 + $0x4] sm:$0xf] %vm218_vm6, %v441_v1 }
 0x262   :  { %v352_v3 = vpop.f32.mrb[4].mxu0 }
 0x263   :  { %580 = shalt.err (!%p577_p0)
}
 0x264   :  { %s581_s17 = scalar_lea.hbm %s856_s10, 128 }
 0x265   :  { %p582_p1 = scmp.ne.s32.totalorder %s856_s10, %s581_s17  ;;  %p585_p2 = scmp.lt.u32.totalorder %s581_s17, %s856_s10 }
 0x267   :  { %p587_p3 = pnand %p585_p2, %p582_p1 }
 0x269   :  { %590 = shalt.err (!%p587_p3)
}
 0x26a   :  { %392 = dma.vmem_to_hbm [thread:$0]  %s387_s29, 128, %s856_s10, [#allocation10], %s644_s27, %s644_s27, %s645_s28   ;;  %v353_v4 = vadd.f32 %v432_v2, %v352_v3  ;;  %v475_v5 = vpop.f32.mrb[5].mxu0 }
 0x26b   :  { %s591_s21 = scalar_lea.vmem %s790_s30, 128  ;;  %p596_p5 = scmp.lt.s32.totalorder %s790_s30, %s790_s30 }
 0x26c   :  { %p592_p4 = scmp.ne.s32.totalorder %s790_s30, %s591_s21  ;;  %p597_p6 = scmp.lt.s32.totalorder %s591_s21, %s591_s21 }
 0x26e   :  { %p598_p7 = por %p597_p6, %p596_p5 }
 0x270   :  { %p599_p8 = pnand %p598_p7, %p592_p4 }
 0x272   :  { %602 = shalt.err (!%p599_p8)
}
 0x273   :  { %s603_s18 = scalar_lea.hbm %s855_s9, 128 }
 0x274   :  { %p604_p9 = scmp.ne.s32.totalorder %s855_s9, %s603_s18  ;;  %p607_p10 = scmp.lt.u32.totalorder %s603_s18, %s855_s9 }
 0x276   :  { %p609_p11 = pnand %p607_p10, %p604_p9 }
 0x278   :  { %612 = shalt.err (!%p609_p11)
}
 0x279   :  { %380 = dma.vmem_to_hbm [thread:$0]  %s790_s30, 128, %s855_s9, [#allocation4], %s644_s27, %s644_s27, %s645_s28   ;;  %v355_v6 = vpop.f32.mrb[6].mxu0  ;;  %v442_v7 = vpack.c.bf16 %v353_v4, %v353_v4 }
 0x27a   :  { %s654_s26 = smov [#allocation11]   ;;  %v356_v8 = vadd.f32 %v432_v2, %v355_v6  ;;  %v476_v9 = vpop.f32.mrb[7].mxu0 }
 0x27b   :  { %s398_s5 = sshll.u32 %s654_s26, 4  ;;  %367 = vst.msk [vmem:[#allocation11] sm:$0xf] %vm218_vm6, %v442_v7  ;;  %s399_s5 = int_to_ptr.vmem [resolvable:$true] %s398_s5 }
 0x27c   :  { %v443_v10 = vpack.c.bf16 %v356_v8, %v356_v8  ;;  %s613_s29 = scalar_lea.vmem %s399_s5, 128  ;;  %p618_p13 = scmp.lt.s32.totalorder %s399_s5, %s399_s5 }
 0x27d   :  { %p614_p12 = scmp.ne.s32.totalorder %s399_s5, %s613_s29  ;;  %p619_p0 = scmp.lt.s32.totalorder %s613_s29, %s613_s29 }
 0x27e   :  { %368 = vst.msk [vmem:[#allocation11 + $0x4] sm:$0xf] %vm218_vm6, %v443_v10 }
 0x27f   :  { %p620_p1 = por %p619_p0, %p618_p13 }
 0x281   :  { %p621_p2 = pnand %p620_p1, %p614_p12 }
 0x283   :  { %624 = shalt.err (!%p621_p2)
}
 0x284   :  { %s625_s30 = scalar_lea.hbm %s857_s11, 128 }
 0x285   :  { %p626_p3 = scmp.ne.s32.totalorder %s857_s11, %s625_s30  ;;  %p629_p4 = scmp.lt.u32.totalorder %s625_s30, %s857_s11 }
 0x287   :  { %p631_p5 = pnand %p629_p4, %p626_p3 }
 0x289   :  { %634 = shalt.err (!%p631_p5)
}
 0x28a   :  { %404 = dma.vmem_to_hbm [thread:$0]  %s399_s5, 128, %s857_s11, [#allocation10], %s644_s27, %s644_s27, %s645_s28  }
 0x28b   :  { %639 = dma.done.wait [#allocation4], 128  }
 0x28c   :  { %640 = vsyncadd [#allocation4], 4294967168 }
 0x28d   :  { %641 = dma.done.wait [#allocation10], 256  }
 0x28e   :  { %642 = vsyncadd [#allocation10], 4294967040 }
 0x28f   :  { %414 = vsyncpa [#allocation3], 1 }
 0x290   :  { %415 = vsyncpa [#allocation6], 1 }
 0x291   :  { %416 = vsyncpa [#allocation4], 1 }
 0x292   :  { %417 = vsyncpa [#allocation10], 1 }

</bundles_post_ra>
